<compile_context>
chip_gen: v7x
topology: tpu7x:2x2x1
jax: 0.10.0
libtpu: 0.0.40
codegen_flags: <defaults>
</compile_context>

<pallas_src>
import functools

import jax
import jax.numpy as jnp
from jax.experimental import pallas as pl
from jax.experimental.pallas import tpu as pltpu

EPS = 1e-5


def _double_conv_kernel(x_ref, w1_ref, w2_ref, gmat_ref, gmatt_ref,
                        g1_ref, b1_ref, g2_ref, b2_ref,
                        o_ref,
                        xp_ref, a1p_ref, y1_ref, y2_ref,
                        s1s_ref, s1q_ref, s2s_ref, s2q_ref,
                        *, n_img, h, w, cin, cout):
    p = pl.program_id(0)          # phase: 0 conv1, 1 bn1+relu+conv2, 2 bn2+relu+store
    t = pl.program_id(1)          # image index
    cnt = float(n_img * h * w)    # BN reduction count (N*H*W)

    def conv3(src_ref, wb_ref):
        # 3x3 conv of one row-padded image slab (h+2, W*C) against banded
        # weights (3, W*C, W*Cout): one bf16 MXU matmul per row tap dh.
        acc = jnp.dot(src_ref[0:h, :].astype(jnp.bfloat16), wb_ref[0],
                      preferred_element_type=jnp.float32)
        acc = acc + jnp.dot(src_ref[1:h + 1, :].astype(jnp.bfloat16), wb_ref[1],
                            preferred_element_type=jnp.float32)
        acc = acc + jnp.dot(src_ref[2:h + 2, :].astype(jnp.bfloat16), wb_ref[2],
                            preferred_element_type=jnp.float32)
        return acc                                          # (h, w*cout) f32

    def accumulate_stats(y, sum_ref, sq_ref):
        # Single-pass BN stats: per-channel sum and sum of squares.  gmat folds
        # the interleaved (w, c) lane layout down to per-channel totals.
        colsum = jnp.sum(y, axis=0, keepdims=True)          # (1, w*cout)
        colsq = jnp.sum(y * y, axis=0, keepdims=True)
        gm = gmat_ref[...]                                  # (w*cout, cout)
        sum_ref[...] += jnp.dot(colsum, gm, preferred_element_type=jnp.float32)
        sq_ref[...] += jnp.dot(colsq, gm, preferred_element_type=jnp.float32)

    def bn_affine(sum_ref, sq_ref, gamma_ref, beta_ref):
        # y_norm = y*scale + shift;  scale = gamma*rsqrt(var+eps),
        # shift = beta - mean*scale  (biased variance, training-mode BN).
        mean = sum_ref[...] / cnt                           # (1, cout)
        var = sq_ref[...] / cnt - mean * mean
        scale_c = gamma_ref[...] * jax.lax.rsqrt(var + EPS)
        shift_c = beta_ref[...] - mean * scale_c
        gmt = gmatt_ref[...]                                # (cout, w*cout)
        scale_w = jnp.dot(scale_c, gmt, preferred_element_type=jnp.float32)
        shift_w = jnp.dot(shift_c, gmt, preferred_element_type=jnp.float32)
        return scale_w, shift_w                             # (1, w*cout) each

    # ------------------- phase 0: conv1 + BN1 statistics -------------------
    @pl.when(p == 0)
    def _phase0():
        @pl.when(t == 0)
        def _init0():
            xp_ref[...] = jnp.zeros_like(xp_ref)   # zero H-padding border rows
            s1s_ref[...] = jnp.zeros_like(s1s_ref)
            s1q_ref[...] = jnp.zeros_like(s1q_ref)

        xp_ref[1:h + 1, :] = x_ref[0]              # interior rows (W pad is in weights)
        y = conv3(xp_ref, w1_ref)
        y1_ref[t] = y
        accumulate_stats(y, s1s_ref, s1q_ref)

    # ------------ phase 1: BN1 + ReLU -> conv2 + BN2 statistics ------------
    @pl.when(p == 1)
    def _phase1():
        @pl.when(t == 0)
        def _init1():
            a1p_ref[...] = jnp.zeros_like(a1p_ref)
            s2s_ref[...] = jnp.zeros_like(s2s_ref)
            s2q_ref[...] = jnp.zeros_like(s2q_ref)

        scale_w, shift_w = bn_affine(s1s_ref, s1q_ref, g1_ref, b1_ref)
        a1 = jnp.maximum(y1_ref[t] * scale_w + shift_w, 0.0)
        a1p_ref[1:h + 1, :] = a1
        y2 = conv3(a1p_ref, w2_ref)
        y2_ref[t] = y2
        accumulate_stats(y2, s2s_ref, s2q_ref)

    # --------------------- phase 2: BN2 + ReLU -> output -------------------
    @pl.when(p == 2)
    def _phase2():
        scale_w, shift_w = bn_affine(s2s_ref, s2q_ref, g2_ref, b2_ref)
        o_ref[0] = jnp.maximum(y2_ref[t] * scale_w + shift_w, 0.0)


def _band_weights(w_oihw, w_sp):
    """(Cout, Cin, 3, 3) conv weight -> (3, W*Cin, W*Cout) banded bf16 matrices.

    band[dh, w_in*Cin + c, w_out*Cout + o] = w[o, c, dh, w_in - w_out + 1]
    (zero outside the 3-tap band), so the dw taps and the width-direction
    'same' zero padding are folded into one MXU contraction per row tap dh.
    """
    cout, cin = w_oihw.shape[0], w_oihw.shape[1]
    wt = jnp.transpose(w_oihw, (2, 3, 1, 0))                     # (3, 3, cin, cout)
    w_in = jnp.arange(w_sp)[:, None]
    w_out = jnp.arange(w_sp)[None, :]
    dw = w_in - w_out + 1                                        # (W, W)
    mask = ((dw >= 0) & (dw < 3)).astype(w_oihw.dtype)
    band = wt[:, jnp.clip(dw, 0, 2), :, :] * mask[None, :, :, None, None]
    band = jnp.transpose(band, (0, 1, 3, 2, 4))                  # (3, w_in, cin, w_out, cout)
    return band.reshape(3, w_sp * cin, w_sp * cout).astype(jnp.bfloat16)


@jax.jit
def double_conv(x_nchw, w1, g1, b1, w2, g2, b2):
    """Fused DoubleConv forward; NCHW in / NCHW out like the PyTorch module."""
    n, cin, h, w = x_nchw.shape
    cout = w1.shape[0]
    wc_in, wc_out = w * cin, w * cout

    # NCHW -> per-image lane-major 2-D slabs (n, h, w*cin).
    x2d = jnp.transpose(x_nchw, (0, 2, 3, 1)).reshape(n, h, wc_in).astype(jnp.float32)
    w1b = _band_weights(w1, w)                                   # (3, w*cin,  w*cout)
    w2b = _band_weights(w2, w)                                   # (3, w*cout, w*cout)

    # Channel gather matrices: interleaved (w, c) lane layout <-> per-channel.
    col = jnp.arange(wc_out)
    gmat = (col[:, None] % cout == jnp.arange(cout)[None, :]).astype(jnp.float32)
    gmat_t = gmat.T

    g1r = g1.reshape(1, cout).astype(jnp.float32)
    b1r = b1.reshape(1, cout).astype(jnp.float32)
    g2r = g2.reshape(1, cout).astype(jnp.float32)
    b2r = b2.reshape(1, cout).astype(jnp.float32)

    kernel = functools.partial(_double_conv_kernel,
                               n_img=n, h=h, w=w, cin=cin, cout=cout)

    out2d = pl.pallas_call(
        kernel,
        out_shape=jax.ShapeDtypeStruct((n, h, wc_out), jnp.float32),
        grid=(3, n),     # (phase, image); image axis carries the BN reduction
        in_specs=[
            # x is only needed in phase 0; keep the block index frozen in later
            # phases so it is not re-fetched from HBM.
            pl.BlockSpec((1, h, wc_in),
                         lambda p, t: (jnp.where(p == 0, t, n - 1), 0, 0)),
            pl.BlockSpec((3, wc_in, wc_out), lambda p, t: (0, 0, 0)),
            pl.BlockSpec((3, wc_out, wc_out), lambda p, t: (0, 0, 0)),
            pl.BlockSpec((wc_out, cout), lambda p, t: (0, 0)),
            pl.BlockSpec((cout, wc_out), lambda p, t: (0, 0)),
            pl.BlockSpec((1, cout), lambda p, t: (0, 0)),
            pl.BlockSpec((1, cout), lambda p, t: (0, 0)),
            pl.BlockSpec((1, cout), lambda p, t: (0, 0)),
            pl.BlockSpec((1, cout), lambda p, t: (0, 0)),
        ],
        # Lane-dense (h, w*cout) output tiles, written only in phase 2.
        out_specs=pl.BlockSpec((1, h, wc_out),
                               lambda p, t: (jnp.where(p == 2, t, 0), 0, 0)),
        scratch_shapes=[
            pltpu.VMEM((h + 2, wc_in), jnp.float32),     # row-padded input image
            pltpu.VMEM((h + 2, wc_out), jnp.float32),    # row-padded BN1+ReLU act
            pltpu.VMEM((n, h, wc_out), jnp.float32),     # conv1 output (resident)
            pltpu.VMEM((n, h, wc_out), jnp.float32),     # conv2 output (resident)
            pltpu.VMEM((1, cout), jnp.float32),          # BN1 sum
            pltpu.VMEM((1, cout), jnp.float32),          # BN1 sum of squares
            pltpu.VMEM((1, cout), jnp.float32),          # BN2 sum
            pltpu.VMEM((1, cout), jnp.float32),          # BN2 sum of squares
        ],
        compiler_params=pltpu.CompilerParams(
            # Both axes are sequential: BN batch stats are a cross-image
            # reduction and the intermediates live in resident VMEM scratch.
            dimension_semantics=("arbitrary", "arbitrary"),
            # Explicit VMEM budget (safe on v7x's 64 MiB physical VMEM); this
            # kernel uses well under 1 MiB of scratch at the test shapes.
            vmem_limit_bytes=32 * 1024 * 1024,
        ),
    )(x2d, w1b, w2b, gmat, gmat_t, g1r, b1r, g2r, b2r)

    # (n, h, w*cout) -> NCHW
    return jnp.transpose(out2d.reshape(n, h, w, cout), (0, 3, 1, 2))


# ------------------------------ pure-JAX reference ------------------------------
def _ref_block(x_nchw, wgt, gamma, beta):
    y = jax.lax.conv_general_dilated(
        x_nchw, wgt, window_strides=(1, 1), padding=((1, 1), (1, 1)),
        dimension_numbers=("NCHW", "OIHW", "NCHW"),
        precision=jax.lax.Precision.HIGHEST)
    mean = jnp.mean(y, axis=(0, 2, 3), keepdims=True)
    var = jnp.mean((y - mean) ** 2, axis=(0, 2, 3), keepdims=True)
    y = (y - mean) * jax.lax.rsqrt(var + EPS)
    y = y * gamma.reshape(1, -1, 1, 1) + beta.reshape(1, -1, 1, 1)
    return jnp.maximum(y, 0.0)


def double_conv_ref(x, w1, g1, b1, w2, g2, b2):
    return _ref_block(_ref_block(x, w1, g1, b1), w2, g2, b2)


if __name__ == "__main__":
    N, CIN, COUT, H, W = 2, 4, 8, 16, 16

    key = jax.random.PRNGKey(0)
    kx, kw1, kw2, kg1, kb1, kg2, kb2 = jax.random.split(key, 7)

    x = jax.random.normal(kx, (N, CIN, H, W), jnp.float32)
    w1 = 0.2 * jax.random.normal(kw1, (COUT, CIN, 3, 3), jnp.float32)
    w2 = 0.2 * jax.random.normal(kw2, (COUT, COUT, 3, 3), jnp.float32)
    g1 = 1.0 + 0.1 * jax.random.normal(kg1, (COUT,), jnp.float32)
    b1 = 0.1 * jax.random.normal(kb1, (COUT,), jnp.float32)
    g2 = 1.0 + 0.1 * jax.random.normal(kg2, (COUT,), jnp.float32)
    b2 = 0.1 * jax.random.normal(kb2, (COUT,), jnp.float32)

    out = jax.block_until_ready(double_conv(x, w1, g1, b1, w2, g2, b2))
    ref = double_conv_ref(x, w1, g1, b1, w2, g2, b2)

    assert out.shape == (N, COUT, H, W), out.shape
    err = jnp.abs(out - ref)
    # bf16 MXU operands (per perf review) vs. an f32 reference -> tolerance is
    # loosened accordingly; mean error stays at the ~1e-2 level.
    assert float(jnp.mean(err)) < 3e-2, float(jnp.mean(err))
    assert jnp.allclose(out, ref, atol=1e-1, rtol=1e-1), float(jnp.max(err))
    print("KERNEL_OK")
</pallas_src>

<mosaic_0001>
module attributes {stable_mosaic.version = 11 : i64} {
  func.func @_double_conv_kernel(%arg0: i32, %arg1: i32, %arg2: memref<1x16x64xf32, #tpu.memory_space<vmem>>, %arg3: memref<3x64x128xbf16, #tpu.memory_space<vmem>>, %arg4: memref<3x128x128xbf16, #tpu.memory_space<vmem>>, %arg5: memref<128x8xf32, #tpu.memory_space<vmem>>, %arg6: memref<8x128xf32, #tpu.memory_space<vmem>>, %arg7: memref<1x8xf32, #tpu.memory_space<vmem>>, %arg8: memref<1x8xf32, #tpu.memory_space<vmem>>, %arg9: memref<1x8xf32, #tpu.memory_space<vmem>>, %arg10: memref<1x8xf32, #tpu.memory_space<vmem>>, %arg11: memref<1x16x128xf32, #tpu.memory_space<vmem>>, %arg12: memref<18x64xf32, #tpu.memory_space<vmem>>, %arg13: memref<18x128xf32, #tpu.memory_space<vmem>>, %arg14: memref<2x16x128xf32, #tpu.memory_space<vmem>>, %arg15: memref<2x16x128xf32, #tpu.memory_space<vmem>>, %arg16: memref<1x8xf32, #tpu.memory_space<vmem>>, %arg17: memref<1x8xf32, #tpu.memory_space<vmem>>, %arg18: memref<1x8xf32, #tpu.memory_space<vmem>>, %arg19: memref<1x8xf32, #tpu.memory_space<vmem>>) attributes {dimension_semantics = [#tpu.dimension_semantics<arbitrary>, #tpu.dimension_semantics<arbitrary>], iteration_bounds = array<i64: 3, 2>, scalar_prefetch = 0 : i64, scratch_operands = 8 : i64, tpu.core_type = #tpu.core_type<tc>, window_params = [{transform_indices = @transform_0, window_bounds = array<i64: 1, 16, 64>}, {pipeline_mode = #tpu.pipeline_mode<synchronous>, transform_indices = @transform_1, window_bounds = array<i64: 3, 64, 128>}, {pipeline_mode = #tpu.pipeline_mode<synchronous>, transform_indices = @transform_2, window_bounds = array<i64: 3, 128, 128>}, {pipeline_mode = #tpu.pipeline_mode<synchronous>, transform_indices = @transform_3, window_bounds = array<i64: 128, 8>}, {pipeline_mode = #tpu.pipeline_mode<synchronous>, transform_indices = @transform_4, window_bounds = array<i64: 8, 128>}, {pipeline_mode = #tpu.pipeline_mode<synchronous>, transform_indices = @transform_5, window_bounds = array<i64: 1, 8>}, {pipeline_mode = #tpu.pipeline_mode<synchronous>, transform_indices = @transform_6, window_bounds = array<i64: 1, 8>}, {pipeline_mode = #tpu.pipeline_mode<synchronous>, transform_indices = @transform_7, window_bounds = array<i64: 1, 8>}, {pipeline_mode = #tpu.pipeline_mode<synchronous>, transform_indices = @transform_8, window_bounds = array<i64: 1, 8>}, {transform_indices = @transform_9, window_bounds = array<i64: 1, 16, 128>}]} {
    %c0_i32 = arith.constant 0 : i32
    %0 = arith.cmpi eq, %arg0, %c0_i32 : i32
    %1 = arith.extui %0 : i1 to i32
    %c0_i32_0 = arith.constant 0 : i32
    %2 = arith.cmpi ne, %1, %c0_i32_0 : i32
    scf.if %2 {
      %c0_i32_3 = arith.constant 0 : i32
      %9 = arith.cmpi eq, %arg1, %c0_i32_3 : i32
      %10 = arith.extui %9 : i1 to i32
      %c0_i32_4 = arith.constant 0 : i32
      %11 = arith.cmpi ne, %10, %c0_i32_4 : i32
      scf.if %11 {
        %cst_40 = arith.constant 0.000000e+00 : f32
        %50 = vector.broadcast %cst_40 : f32 to vector<18x64xf32>
        %c0_41 = arith.constant 0 : index
        %c0_42 = arith.constant 0 : index
        %51 = vector.load %arg12[%c0_41, %c0_42] : memref<18x64xf32, #tpu.memory_space<vmem>>, vector<18x64xf32>
        tpu.vector_store %arg12[%c0_41, %c0_42], %50 {strides = array<i32>} : memref<18x64xf32, #tpu.memory_space<vmem>>, vector<18x64xf32>,
        %cst_43 = arith.constant 0.000000e+00 : f32
        %52 = vector.broadcast %cst_43 : f32 to vector<1x8xf32>
        %c0_44 = arith.constant 0 : index
        %c0_45 = arith.constant 0 : index
        %53 = vector.load %arg16[%c0_44, %c0_45] : memref<1x8xf32, #tpu.memory_space<vmem>>, vector<1x8xf32>
        tpu.vector_store %arg16[%c0_44, %c0_45], %52 {strides = array<i32>} : memref<1x8xf32, #tpu.memory_space<vmem>>, vector<1x8xf32>,
        %cst_46 = arith.constant 0.000000e+00 : f32
        %54 = vector.broadcast %cst_46 : f32 to vector<1x8xf32>
        %c0_47 = arith.constant 0 : index
        %c0_48 = arith.constant 0 : index
        %55 = vector.load %arg17[%c0_47, %c0_48] : memref<1x8xf32, #tpu.memory_space<vmem>>, vector<1x8xf32>
        tpu.vector_store %arg17[%c0_47, %c0_48], %54 {strides = array<i32>} : memref<1x8xf32, #tpu.memory_space<vmem>>, vector<1x8xf32>,
      } else {
      }
      %c0 = arith.constant 0 : index
      %c0_5 = arith.constant 0 : index
      %c0_6 = arith.constant 0 : index
      %12 = vector.load %arg2[%c0, %c0_5, %c0_6] : memref<1x16x64xf32, #tpu.memory_space<vmem>>, vector<1x16x64xf32>
      %13 = vector.shape_cast %12 : vector<1x16x64xf32> to vector<16x64xf32>
      %c1 = arith.constant 1 : index
      %c0_7 = arith.constant 0 : index
      %14 = vector.load %arg12[%c1, %c0_7] : memref<18x64xf32, #tpu.memory_space<vmem>>, vector<16x64xf32>
      tpu.vector_store %arg12[%c1, %c0_7], %13 {strides = array<i32>} : memref<18x64xf32, #tpu.memory_space<vmem>>, vector<16x64xf32>,
      %c0_8 = arith.constant 0 : index
      %c0_9 = arith.constant 0 : index
      %15 = vector.load %arg12[%c0_8, %c0_9] : memref<18x64xf32, #tpu.memory_space<vmem>>, vector<16x64xf32>
      %16 = arith.truncf %15 : vector<16x64xf32> to vector<16x64xbf16>
      %c0_10 = arith.constant 0 : index
      %c0_11 = arith.constant 0 : index
      %c0_12 = arith.constant 0 : index
      %17 = vector.load %arg3[%c0_10, %c0_11, %c0_12] : memref<3x64x128xbf16, #tpu.memory_space<vmem>>, vector<1x64x128xbf16>
      %18 = vector.shape_cast %17 : vector<1x64x128xbf16> to vector<64x128xbf16>
      %cst = arith.constant dense<0.000000e+00> : vector<16x128xf32>
      %19 = tpu.matmul %16, %18, %cst {dimension_numbers = #tpu.dot_dimension_numbers<[1], [0], [0], [1], [0, 0, 1, 1], [], []>} : vector<16x64xbf16>, vector<64x128xbf16>, vector<16x128xf32> -> vector<16x128xf32>
      %c1_13 = arith.constant 1 : index
      %c0_14 = arith.constant 0 : index
      %20 = vector.load %arg12[%c1_13, %c0_14] : memref<18x64xf32, #tpu.memory_space<vmem>>, vector<16x64xf32>
      %21 = arith.truncf %20 : vector<16x64xf32> to vector<16x64xbf16>
      %c1_15 = arith.constant 1 : index
      %c0_16 = arith.constant 0 : index
      %c0_17 = arith.constant 0 : index
      %22 = vector.load %arg3[%c1_15, %c0_16, %c0_17] : memref<3x64x128xbf16, #tpu.memory_space<vmem>>, vector<1x64x128xbf16>
      %23 = vector.shape_cast %22 : vector<1x64x128xbf16> to vector<64x128xbf16>
      %cst_18 = arith.constant dense<0.000000e+00> : vector<16x128xf32>
      %24 = tpu.matmul %21, %23, %cst_18 {dimension_numbers = #tpu.dot_dimension_numbers<[1], [0], [0], [1], [0, 0, 1, 1], [], []>} : vector<16x64xbf16>, vector<64x128xbf16>, vector<16x128xf32> -> vector<16x128xf32>
      %25 = arith.addf %19, %24 : vector<16x128xf32>
      %c2 = arith.constant 2 : index
      %c0_19 = arith.constant 0 : index
      %26 = vector.load %arg12[%c2, %c0_19] : memref<18x64xf32, #tpu.memory_space<vmem>>, vector<16x64xf32>
      %27 = arith.truncf %26 : vector<16x64xf32> to vector<16x64xbf16>
      %c2_20 = arith.constant 2 : index
      %c0_21 = arith.constant 0 : index
      %c0_22 = arith.constant 0 : index
      %28 = vector.load %arg3[%c2_20, %c0_21, %c0_22] : memref<3x64x128xbf16, #tpu.memory_space<vmem>>, vector<1x64x128xbf16>
      %29 = vector.shape_cast %28 : vector<1x64x128xbf16> to vector<64x128xbf16>
      %cst_23 = arith.constant dense<0.000000e+00> : vector<16x128xf32>
      %30 = tpu.matmul %27, %29, %cst_23 {dimension_numbers = #tpu.dot_dimension_numbers<[1], [0], [0], [1], [0, 0, 1, 1], [], []>} : vector<16x64xbf16>, vector<64x128xbf16>, vector<16x128xf32> -> vector<16x128xf32>
      %31 = arith.addf %25, %30 : vector<16x128xf32>
      %32 = arith.index_cast %arg1 : i32 to index
      %c0_24 = arith.constant 0 : index
      %c0_25 = arith.constant 0 : index
      %33 = vector.load %arg14[%32, %c0_24, %c0_25] : memref<2x16x128xf32, #tpu.memory_space<vmem>>, vector<1x16x128xf32>
      %34 = vector.shape_cast %33 : vector<1x16x128xf32> to vector<16x128xf32>
      %35 = vector.shape_cast %31 : vector<16x128xf32> to vector<1x16x128xf32>
      tpu.vector_store %arg14[%32, %c0_24, %c0_25], %35 {strides = array<i32>} : memref<2x16x128xf32, #tpu.memory_space<vmem>>, vector<1x16x128xf32>,
      %cst_26 = arith.constant dense<0.000000e+00> : vector<128xf32>
      %36 = vector.multi_reduction <add>, %31, %cst_26 [0] : vector<16x128xf32> to vector<128xf32>
      %37 = vector.shape_cast %36 : vector<128xf32> to vector<1x128xf32>
      %38 = arith.mulf %31, %31 : vector<16x128xf32>
      %cst_27 = arith.constant dense<0.000000e+00> : vector<128xf32>
      %39 = vector.multi_reduction <add>, %38, %cst_27 [0] : vector<16x128xf32> to vector<128xf32>
      %40 = vector.shape_cast %39 : vector<128xf32> to vector<1x128xf32>
      %c0_28 = arith.constant 0 : index
      %c0_29 = arith.constant 0 : index
      %41 = vector.load %arg5[%c0_28, %c0_29] : memref<128x8xf32, #tpu.memory_space<vmem>>, vector<128x8xf32>
      %c0_30 = arith.constant 0 : index
      %c0_31 = arith.constant 0 : index
      %42 = vector.load %arg16[%c0_30, %c0_31] : memref<1x8xf32, #tpu.memory_space<vmem>>, vector<1x8xf32>
      %cst_32 = arith.constant dense<0.000000e+00> : vector<1x8xf32>
      %43 = tpu.matmul %37, %41, %cst_32 {dimension_numbers = #tpu.dot_dimension_numbers<[1], [0], [0], [1], [0, 0, 1, 1], [], []>} : vector<1x128xf32>, vector<128x8xf32>, vector<1x8xf32> -> vector<1x8xf32>
      %44 = arith.addf %42, %43 : vector<1x8xf32>
      %c0_33 = arith.constant 0 : index
      %c0_34 = arith.constant 0 : index
      %45 = vector.load %arg16[%c0_33, %c0_34] : memref<1x8xf32, #tpu.memory_space<vmem>>, vector<1x8xf32>
      tpu.vector_store %arg16[%c0_33, %c0_34], %44 {strides = array<i32>} : memref<1x8xf32, #tpu.memory_space<vmem>>, vector<1x8xf32>,
      %c0_35 = arith.constant 0 : index
      %c0_36 = arith.constant 0 : index
      %46 = vector.load %arg17[%c0_35, %c0_36] : memref<1x8xf32, #tpu.memory_space<vmem>>, vector<1x8xf32>
      %cst_37 = arith.constant dense<0.000000e+00> : vector<1x8xf32>
      %47 = tpu.matmul %40, %41, %cst_37 {dimension_numbers = #tpu.dot_dimension_numbers<[1], [0], [0], [1], [0, 0, 1, 1], [], []>} : vector<1x128xf32>, vector<128x8xf32>, vector<1x8xf32> -> vector<1x8xf32>
      %48 = arith.addf %46, %47 : vector<1x8xf32>
      %c0_38 = arith.constant 0 : index
      %c0_39 = arith.constant 0 : index
      %49 = vector.load %arg17[%c0_38, %c0_39] : memref<1x8xf32, #tpu.memory_space<vmem>>, vector<1x8xf32>
      tpu.vector_store %arg17[%c0_38, %c0_39], %48 {strides = array<i32>} : memref<1x8xf32, #tpu.memory_space<vmem>>, vector<1x8xf32>,
    } else {
    }
    %c1_i32 = arith.constant 1 : i32
    %3 = arith.cmpi eq, %arg0, %c1_i32 : i32
    %4 = arith.extui %3 : i1 to i32
    %c0_i32_1 = arith.constant 0 : i32
    %5 = arith.cmpi ne, %4, %c0_i32_1 : i32
    scf.if %5 {
      %c0_i32_3 = arith.constant 0 : i32
      %9 = arith.cmpi eq, %arg1, %c0_i32_3 : i32
      %10 = arith.extui %9 : i1 to i32
      %c0_i32_4 = arith.constant 0 : i32
      %11 = arith.cmpi ne, %10, %c0_i32_4 : i32
      scf.if %11 {
        %cst_55 = arith.constant 0.000000e+00 : f32
        %76 = vector.broadcast %cst_55 : f32 to vector<18x128xf32>
        %c0_56 = arith.constant 0 : index
        %c0_57 = arith.constant 0 : index
        %77 = vector.load %arg13[%c0_56, %c0_57] : memref<18x128xf32, #tpu.memory_space<vmem>>, vector<18x128xf32>
        tpu.vector_store %arg13[%c0_56, %c0_57], %76 {strides = array<i32>} : memref<18x128xf32, #tpu.memory_space<vmem>>, vector<18x128xf32>,
        %cst_58 = arith.constant 0.000000e+00 : f32
        %78 = vector.broadcast %cst_58 : f32 to vector<1x8xf32>
        %c0_59 = arith.constant 0 : index
        %c0_60 = arith.constant 0 : index
        %79 = vector.load %arg18[%c0_59, %c0_60] : memref<1x8xf32, #tpu.memory_space<vmem>>, vector<1x8xf32>
        tpu.vector_store %arg18[%c0_59, %c0_60], %78 {strides = array<i32>} : memref<1x8xf32, #tpu.memory_space<vmem>>, vector<1x8xf32>,
        %cst_61 = arith.constant 0.000000e+00 : f32
        %80 = vector.broadcast %cst_61 : f32 to vector<1x8xf32>
        %c0_62 = arith.constant 0 : index
        %c0_63 = arith.constant 0 : index
        %81 = vector.load %arg19[%c0_62, %c0_63] : memref<1x8xf32, #tpu.memory_space<vmem>>, vector<1x8xf32>
        tpu.vector_store %arg19[%c0_62, %c0_63], %80 {strides = array<i32>} : memref<1x8xf32, #tpu.memory_space<vmem>>, vector<1x8xf32>,
      } else {
      }
      %c0 = arith.constant 0 : index
      %c0_5 = arith.constant 0 : index
      %12 = vector.load %arg16[%c0, %c0_5] : memref<1x8xf32, #tpu.memory_space<vmem>>, vector<1x8xf32>
      %cst = arith.constant 5.120000e+02 : f32
      %13 = vector.broadcast %cst : f32 to vector<1x8xf32>
      %14 = arith.divf %12, %13 : vector<1x8xf32>
      %c0_6 = arith.constant 0 : index
      %c0_7 = arith.constant 0 : index
      %15 = vector.load %arg17[%c0_6, %c0_7] : memref<1x8xf32, #tpu.memory_space<vmem>>, vector<1x8xf32>
      %cst_8 = arith.constant 5.120000e+02 : f32
      %16 = vector.broadcast %cst_8 : f32 to vector<1x8xf32>
      %17 = arith.divf %15, %16 : vector<1x8xf32>
      %18 = arith.mulf %14, %14 : vector<1x8xf32>
      %19 = arith.subf %17, %18 : vector<1x8xf32>
      %c0_9 = arith.constant 0 : index
      %c0_10 = arith.constant 0 : index
      %20 = vector.load %arg7[%c0_9, %c0_10] : memref<1x8xf32, #tpu.memory_space<vmem>>, vector<1x8xf32>
      %cst_11 = arith.constant 9.99999974E-6 : f32
      %21 = vector.broadcast %cst_11 : f32 to vector<1x8xf32>
      %22 = arith.addf %19, %21 : vector<1x8xf32>
      %23 = math.rsqrt %22 : vector<1x8xf32>
      %24 = arith.mulf %20, %23 : vector<1x8xf32>
      %c0_12 = arith.constant 0 : index
      %c0_13 = arith.constant 0 : index
      %25 = vector.load %arg8[%c0_12, %c0_13] : memref<1x8xf32, #tpu.memory_space<vmem>>, vector<1x8xf32>
      %26 = arith.mulf %14, %24 : vector<1x8xf32>
      %27 = arith.subf %25, %26 : vector<1x8xf32>
      %c0_14 = arith.constant 0 : index
      %c0_15 = arith.constant 0 : index
      %28 = vector.load %arg6[%c0_14, %c0_15] : memref<8x128xf32, #tpu.memory_space<vmem>>, vector<8x128xf32>
      %cst_16 = arith.constant dense<0.000000e+00> : vector<1x128xf32>
      %29 = tpu.matmul %24, %28, %cst_16 {dimension_numbers = #tpu.dot_dimension_numbers<[1], [0], [0], [1], [0, 0, 1, 1], [], []>} : vector<1x8xf32>, vector<8x128xf32>, vector<1x128xf32> -> vector<1x128xf32>
      %cst_17 = arith.constant dense<0.000000e+00> : vector<1x128xf32>
      %30 = tpu.matmul %27, %28, %cst_17 {dimension_numbers = #tpu.dot_dimension_numbers<[1], [0], [0], [1], [0, 0, 1, 1], [], []>} : vector<1x8xf32>, vector<8x128xf32>, vector<1x128xf32> -> vector<1x128xf32>
      %31 = arith.index_cast %arg1 : i32 to index
      %c0_18 = arith.constant 0 : index
      %c0_19 = arith.constant 0 : index
      %32 = vector.load %arg14[%31, %c0_18, %c0_19] : memref<2x16x128xf32, #tpu.memory_space<vmem>>, vector<1x16x128xf32>
      %33 = vector.shape_cast %32 : vector<1x16x128xf32> to vector<16x128xf32>
      %34 = vector.broadcast %29 : vector<1x128xf32> to vector<16x128xf32>
      %35 = arith.mulf %33, %34 : vector<16x128xf32>
      %36 = vector.broadcast %30 : vector<1x128xf32> to vector<16x128xf32>
      %37 = arith.addf %35, %36 : vector<16x128xf32>
      %cst_20 = arith.constant 0.000000e+00 : f32
      %38 = vector.broadcast %cst_20 : f32 to vector<16x128xf32>
      %39 = arith.maximumf %37, %38 : vector<16x128xf32>
      %c1 = arith.constant 1 : index
      %c0_21 = arith.constant 0 : index
      %40 = vector.load %arg13[%c1, %c0_21] : memref<18x128xf32, #tpu.memory_space<vmem>>, vector<16x128xf32>
      tpu.vector_store %arg13[%c1, %c0_21], %39 {strides = array<i32>} : memref<18x128xf32, #tpu.memory_space<vmem>>, vector<16x128xf32>,
      %c0_22 = arith.constant 0 : index
      %c0_23 = arith.constant 0 : index
      %41 = vector.load %arg13[%c0_22, %c0_23] : memref<18x128xf32, #tpu.memory_space<vmem>>, vector<16x128xf32>
      %42 = arith.truncf %41 : vector<16x128xf32> to vector<16x128xbf16>
      %c0_24 = arith.constant 0 : index
      %c0_25 = arith.constant 0 : index
      %c0_26 = arith.constant 0 : index
      %43 = vector.load %arg4[%c0_24, %c0_25, %c0_26] : memref<3x128x128xbf16, #tpu.memory_space<vmem>>, vector<1x128x128xbf16>
      %44 = vector.shape_cast %43 : vector<1x128x128xbf16> to vector<128x128xbf16>
      %cst_27 = arith.constant dense<0.000000e+00> : vector<16x128xf32>
      %45 = tpu.matmul %42, %44, %cst_27 {dimension_numbers = #tpu.dot_dimension_numbers<[1], [0], [0], [1], [0, 0, 1, 1], [], []>} : vector<16x128xbf16>, vector<128x128xbf16>, vector<16x128xf32> -> vector<16x128xf32>
      %c1_28 = arith.constant 1 : index
      %c0_29 = arith.constant 0 : index
      %46 = vector.load %arg13[%c1_28, %c0_29] : memref<18x128xf32, #tpu.memory_space<vmem>>, vector<16x128xf32>
      %47 = arith.truncf %46 : vector<16x128xf32> to vector<16x128xbf16>
      %c1_30 = arith.constant 1 : index
      %c0_31 = arith.constant 0 : index
      %c0_32 = arith.constant 0 : index
      %48 = vector.load %arg4[%c1_30, %c0_31, %c0_32] : memref<3x128x128xbf16, #tpu.memory_space<vmem>>, vector<1x128x128xbf16>
      %49 = vector.shape_cast %48 : vector<1x128x128xbf16> to vector<128x128xbf16>
      %cst_33 = arith.constant dense<0.000000e+00> : vector<16x128xf32>
      %50 = tpu.matmul %47, %49, %cst_33 {dimension_numbers = #tpu.dot_dimension_numbers<[1], [0], [0], [1], [0, 0, 1, 1], [], []>} : vector<16x128xbf16>, vector<128x128xbf16>, vector<16x128xf32> -> vector<16x128xf32>
      %51 = arith.addf %45, %50 : vector<16x128xf32>
      %c2 = arith.constant 2 : index
      %c0_34 = arith.constant 0 : index
      %52 = vector.load %arg13[%c2, %c0_34] : memref<18x128xf32, #tpu.memory_space<vmem>>, vector<16x128xf32>
      %53 = arith.truncf %52 : vector<16x128xf32> to vector<16x128xbf16>
      %c2_35 = arith.constant 2 : index
      %c0_36 = arith.constant 0 : index
      %c0_37 = arith.constant 0 : index
      %54 = vector.load %arg4[%c2_35, %c0_36, %c0_37] : memref<3x128x128xbf16, #tpu.memory_space<vmem>>, vector<1x128x128xbf16>
      %55 = vector.shape_cast %54 : vector<1x128x128xbf16> to vector<128x128xbf16>
      %cst_38 = arith.constant dense<0.000000e+00> : vector<16x128xf32>
      %56 = tpu.matmul %53, %55, %cst_38 {dimension_numbers = #tpu.dot_dimension_numbers<[1], [0], [0], [1], [0, 0, 1, 1], [], []>} : vector<16x128xbf16>, vector<128x128xbf16>, vector<16x128xf32> -> vector<16x128xf32>
      %57 = arith.addf %51, %56 : vector<16x128xf32>
      %58 = arith.index_cast %arg1 : i32 to index
      %c0_39 = arith.constant 0 : index
      %c0_40 = arith.constant 0 : index
      %59 = vector.load %arg15[%58, %c0_39, %c0_40] : memref<2x16x128xf32, #tpu.memory_space<vmem>>, vector<1x16x128xf32>
      %60 = vector.shape_cast %59 : vector<1x16x128xf32> to vector<16x128xf32>
      %61 = vector.shape_cast %57 : vector<16x128xf32> to vector<1x16x128xf32>
      tpu.vector_store %arg15[%58, %c0_39, %c0_40], %61 {strides = array<i32>} : memref<2x16x128xf32, #tpu.memory_space<vmem>>, vector<1x16x128xf32>,
      %cst_41 = arith.constant dense<0.000000e+00> : vector<128xf32>
      %62 = vector.multi_reduction <add>, %57, %cst_41 [0] : vector<16x128xf32> to vector<128xf32>
      %63 = vector.shape_cast %62 : vector<128xf32> to vector<1x128xf32>
      %64 = arith.mulf %57, %57 : vector<16x128xf32>
      %cst_42 = arith.constant dense<0.000000e+00> : vector<128xf32>
      %65 = vector.multi_reduction <add>, %64, %cst_42 [0] : vector<16x128xf32> to vector<128xf32>
      %66 = vector.shape_cast %65 : vector<128xf32> to vector<1x128xf32>
      %c0_43 = arith.constant 0 : index
      %c0_44 = arith.constant 0 : index
      %67 = vector.load %arg5[%c0_43, %c0_44] : memref<128x8xf32, #tpu.memory_space<vmem>>, vector<128x8xf32>
      %c0_45 = arith.constant 0 : index
      %c0_46 = arith.constant 0 : index
      %68 = vector.load %arg18[%c0_45, %c0_46] : memref<1x8xf32, #tpu.memory_space<vmem>>, vector<1x8xf32>
      %cst_47 = arith.constant dense<0.000000e+00> : vector<1x8xf32>
      %69 = tpu.matmul %63, %67, %cst_47 {dimension_numbers = #tpu.dot_dimension_numbers<[1], [0], [0], [1], [0, 0, 1, 1], [], []>} : vector<1x128xf32>, vector<128x8xf32>, vector<1x8xf32> -> vector<1x8xf32>
      %70 = arith.addf %68, %69 : vector<1x8xf32>
      %c0_48 = arith.constant 0 : index
      %c0_49 = arith.constant 0 : index
      %71 = vector.load %arg18[%c0_48, %c0_49] : memref<1x8xf32, #tpu.memory_space<vmem>>, vector<1x8xf32>
      tpu.vector_store %arg18[%c0_48, %c0_49], %70 {strides = array<i32>} : memref<1x8xf32, #tpu.memory_space<vmem>>, vector<1x8xf32>,
      %c0_50 = arith.constant 0 : index
      %c0_51 = arith.constant 0 : index
      %72 = vector.load %arg19[%c0_50, %c0_51] : memref<1x8xf32, #tpu.memory_space<vmem>>, vector<1x8xf32>
      %cst_52 = arith.constant dense<0.000000e+00> : vector<1x8xf32>
      %73 = tpu.matmul %66, %67, %cst_52 {dimension_numbers = #tpu.dot_dimension_numbers<[1], [0], [0], [1], [0, 0, 1, 1], [], []>} : vector<1x128xf32>, vector<128x8xf32>, vector<1x8xf32> -> vector<1x8xf32>
      %74 = arith.addf %72, %73 : vector<1x8xf32>
      %c0_53 = arith.constant 0 : index
      %c0_54 = arith.constant 0 : index
      %75 = vector.load %arg19[%c0_53, %c0_54] : memref<1x8xf32, #tpu.memory_space<vmem>>, vector<1x8xf32>
      tpu.vector_store %arg19[%c0_53, %c0_54], %74 {strides = array<i32>} : memref<1x8xf32, #tpu.memory_space<vmem>>, vector<1x8xf32>,
    } else {
    }
    %c2_i32 = arith.constant 2 : i32
    %6 = arith.cmpi eq, %arg0, %c2_i32 : i32
    %7 = arith.extui %6 : i1 to i32
    %c0_i32_2 = arith.constant 0 : i32
    %8 = arith.cmpi ne, %7, %c0_i32_2 : i32
    scf.if %8 {
      %c0 = arith.constant 0 : index
      %c0_3 = arith.constant 0 : index
      %9 = vector.load %arg18[%c0, %c0_3] : memref<1x8xf32, #tpu.memory_space<vmem>>, vector<1x8xf32>
      %cst = arith.constant 5.120000e+02 : f32
      %10 = vector.broadcast %cst : f32 to vector<1x8xf32>
      %11 = arith.divf %9, %10 : vector<1x8xf32>
      %c0_4 = arith.constant 0 : index
      %c0_5 = arith.constant 0 : index
      %12 = vector.load %arg19[%c0_4, %c0_5] : memref<1x8xf32, #tpu.memory_space<vmem>>, vector<1x8xf32>
      %cst_6 = arith.constant 5.120000e+02 : f32
      %13 = vector.broadcast %cst_6 : f32 to vector<1x8xf32>
      %14 = arith.divf %12, %13 : vector<1x8xf32>
      %15 = arith.mulf %11, %11 : vector<1x8xf32>
      %16 = arith.subf %14, %15 : vector<1x8xf32>
      %c0_7 = arith.constant 0 : index
      %c0_8 = arith.constant 0 : index
      %17 = vector.load %arg9[%c0_7, %c0_8] : memref<1x8xf32, #tpu.memory_space<vmem>>, vector<1x8xf32>
      %cst_9 = arith.constant 9.99999974E-6 : f32
      %18 = vector.broadcast %cst_9 : f32 to vector<1x8xf32>
      %19 = arith.addf %16, %18 : vector<1x8xf32>
      %20 = math.rsqrt %19 : vector<1x8xf32>
      %21 = arith.mulf %17, %20 : vector<1x8xf32>
      %c0_10 = arith.constant 0 : index
      %c0_11 = arith.constant 0 : index
      %22 = vector.load %arg10[%c0_10, %c0_11] : memref<1x8xf32, #tpu.memory_space<vmem>>, vector<1x8xf32>
      %23 = arith.mulf %11, %21 : vector<1x8xf32>
      %24 = arith.subf %22, %23 : vector<1x8xf32>
      %c0_12 = arith.constant 0 : index
      %c0_13 = arith.constant 0 : index
      %25 = vector.load %arg6[%c0_12, %c0_13] : memref<8x128xf32, #tpu.memory_space<vmem>>, vector<8x128xf32>
      %cst_14 = arith.constant dense<0.000000e+00> : vector<1x128xf32>
      %26 = tpu.matmul %21, %25, %cst_14 {dimension_numbers = #tpu.dot_dimension_numbers<[1], [0], [0], [1], [0, 0, 1, 1], [], []>} : vector<1x8xf32>, vector<8x128xf32>, vector<1x128xf32> -> vector<1x128xf32>
      %cst_15 = arith.constant dense<0.000000e+00> : vector<1x128xf32>
      %27 = tpu.matmul %24, %25, %cst_15 {dimension_numbers = #tpu.dot_dimension_numbers<[1], [0], [0], [1], [0, 0, 1, 1], [], []>} : vector<1x8xf32>, vector<8x128xf32>, vector<1x128xf32> -> vector<1x128xf32>
      %28 = arith.index_cast %arg1 : i32 to index
      %c0_16 = arith.constant 0 : index
      %c0_17 = arith.constant 0 : index
      %29 = vector.load %arg15[%28, %c0_16, %c0_17] : memref<2x16x128xf32, #tpu.memory_space<vmem>>, vector<1x16x128xf32>
      %30 = vector.shape_cast %29 : vector<1x16x128xf32> to vector<16x128xf32>
      %31 = vector.broadcast %26 : vector<1x128xf32> to vector<16x128xf32>
      %32 = arith.mulf %30, %31 : vector<16x128xf32>
      %33 = vector.broadcast %27 : vector<1x128xf32> to vector<16x128xf32>
      %34 = arith.addf %32, %33 : vector<16x128xf32>
      %cst_18 = arith.constant 0.000000e+00 : f32
      %35 = vector.broadcast %cst_18 : f32 to vector<16x128xf32>
      %36 = arith.maximumf %34, %35 : vector<16x128xf32>
      %c0_19 = arith.constant 0 : index
      %c0_20 = arith.constant 0 : index
      %c0_21 = arith.constant 0 : index
      %37 = vector.load %arg11[%c0_19, %c0_20, %c0_21] : memref<1x16x128xf32, #tpu.memory_space<vmem>>, vector<1x16x128xf32>
      %38 = vector.shape_cast %37 : vector<1x16x128xf32> to vector<16x128xf32>
      %39 = vector.shape_cast %36 : vector<16x128xf32> to vector<1x16x128xf32>
      tpu.vector_store %arg11[%c0_19, %c0_20, %c0_21], %39 {strides = array<i32>} : memref<1x16x128xf32, #tpu.memory_space<vmem>>, vector<1x16x128xf32>,
    } else {
    }
    return
  }
  func.func @transform_0(%arg0: i32, %arg1: i32) -> (i32, i32, i32) {
    %c0_i32 = arith.constant 0 : i32
    %0 = arith.cmpi eq, %arg0, %c0_i32 : i32
    %c1_i32 = arith.constant 1 : i32
    %1 = arith.select %0, %arg1, %c1_i32 : i32
    %c0_i32_0 = arith.constant 0 : i32
    %c0_i32_1 = arith.constant 0 : i32
    %c0_i32_2 = arith.constant 0 : i32
    return %1, %c0_i32_0, %c0_i32_1 : i32, i32, i32
  }
  func.func @transform_1(%arg0: i32, %arg1: i32) -> (i32, i32, i32) {
    %c0_i32 = arith.constant 0 : i32
    %c0_i32_0 = arith.constant 0 : i32
    %c0_i32_1 = arith.constant 0 : i32
    %c0_i32_2 = arith.constant 0 : i32
    return %c0_i32, %c0_i32_0, %c0_i32_1 : i32, i32, i32
  }
  func.func @transform_2(%arg0: i32, %arg1: i32) -> (i32, i32, i32) {
    %c0_i32 = arith.constant 0 : i32
    %c0_i32_0 = arith.constant 0 : i32
    %c0_i32_1 = arith.constant 0 : i32
    %c0_i32_2 = arith.constant 0 : i32
    return %c0_i32, %c0_i32_0, %c0_i32_1 : i32, i32, i32
  }
  func.func @transform_3(%arg0: i32, %arg1: i32) -> (i32, i32) {
    %c0_i32 = arith.constant 0 : i32
    %c0_i32_0 = arith.constant 0 : i32
    %c0_i32_1 = arith.constant 0 : i32
    return %c0_i32, %c0_i32_0 : i32, i32
  }
  func.func @transform_4(%arg0: i32, %arg1: i32) -> (i32, i32) {
    %c0_i32 = arith.constant 0 : i32
    %c0_i32_0 = arith.constant 0 : i32
    %c0_i32_1 = arith.constant 0 : i32
    return %c0_i32, %c0_i32_0 : i32, i32
  }
  func.func @transform_5(%arg0: i32, %arg1: i32) -> (i32, i32) {
    %c0_i32 = arith.constant 0 : i32
    %c0_i32_0 = arith.constant 0 : i32
    %c0_i32_1 = arith.constant 0 : i32
    return %c0_i32, %c0_i32_0 : i32, i32
  }
  func.func @transform_6(%arg0: i32, %arg1: i32) -> (i32, i32) {
    %c0_i32 = arith.constant 0 : i32
    %c0_i32_0 = arith.constant 0 : i32
    %c0_i32_1 = arith.constant 0 : i32
    return %c0_i32, %c0_i32_0 : i32, i32
  }
  func.func @transform_7(%arg0: i32, %arg1: i32) -> (i32, i32) {
    %c0_i32 = arith.constant 0 : i32
    %c0_i32_0 = arith.constant 0 : i32
    %c0_i32_1 = arith.constant 0 : i32
    return %c0_i32, %c0_i32_0 : i32, i32
  }
  func.func @transform_8(%arg0: i32, %arg1: i32) -> (i32, i32) {
    %c0_i32 = arith.constant 0 : i32
    %c0_i32_0 = arith.constant 0 : i32
    %c0_i32_1 = arith.constant 0 : i32
    return %c0_i32, %c0_i32_0 : i32, i32
  }
  func.func @transform_9(%arg0: i32, %arg1: i32) -> (i32, i32, i32) {
    %c2_i32 = arith.constant 2 : i32
    %0 = arith.cmpi eq, %arg0, %c2_i32 : i32
    %c0_i32 = arith.constant 0 : i32
    %1 = arith.select %0, %arg1, %c0_i32 : i32
    %c0_i32_0 = arith.constant 0 : i32
    %c0_i32_1 = arith.constant 0 : i32
    %c0_i32_2 = arith.constant 0 : i32
    return %1, %c0_i32_0, %c0_i32_1 : i32, i32, i32
  }
}

</mosaic_0001>

<bundles_post_ra>
// kernel: double_conv.1
= control target key start
LH: loop header
LB: loop body
LE: loop exit
PB: predicated region body
PF: predicated region fallthrough
CT: control target
= control target key end

     0   :  { %s2574_s30 = smov 0   ;;  %s2576_s10 = smov 0   ;;  %s2986_s0 = inlined_call_operand.vmem [shape: f32[2,16,64], index: 0, kind: input, shape index: {}]   ;;  %s2987_s1 = inlined_call_operand.vmem [shape: bf16[3,64,128], index: 1, kind: input, shape index: {}]   ;;  %s2988_s2 = inlined_call_operand.vmem [shape: bf16[3,128,128], index: 2, kind: input, shape index: {}]   ;;  %s2989_s3 = inlined_call_operand.vmem [shape: f32[128,8], index: 3, kind: input, shape index: {}]   ;;  %s2990_s4 = inlined_call_operand.vmem [shape: f32[8,128], index: 4, kind: input, shape index: {}]   ;;  %s2991_s5 = inlined_call_operand.vmem [shape: f32[1,8], index: 5, kind: input, shape index: {}]   ;;  %s2992_s6 = inlined_call_operand.vmem [shape: f32[1,8], index: 6, kind: input, shape index: {}]   ;;  %s2993_s7 = inlined_call_operand.vmem [shape: f32[1,8], index: 7, kind: input, shape index: {}]   ;;  %s2994_s8 = inlined_call_operand.vmem [shape: f32[1,8], index: 8, kind: input, shape index: {}]   ;;  %s2995_s9 = inlined_call_operand.vmem [shape: f32[2,16,128], index: 9, kind: output, shape index: {}]  }
   0x1   :  { %s2578_s11 = smov 0   ;;  %s2580_s12 = smov 0  }
   0x2   :  { %s2582_s13 = smov 0  }
   0x3 LB: > { %s28_s14 = sadd.s32 1, %s2504_s11  ;;  %s31_s15 = sadd.s32 1, %s2508_s12  ;;  %s2512_s13 = sphi %s2582_s13, %s19_s13   ;;  %s2508_s12 = sphi %s2580_s12, %s2999_s12   ;;  %s2504_s11 = sphi %s2578_s11, %s2998_s11   ;;  %s2500_s10 = sphi %s2576_s10, %s2997_s10   ;;  %s2496_s30 = sphi %s2574_s30, %s2996_s30  }
   0x4   : > { %p29_p0 = scmp.ge.s32.totalorder %s28_s14, 2  ;;  %p1792_p1 = scmp.ge.s32.totalorder %s2512_s13, 1 }
   0x5   : > { %p311_p2 = scmp.lt.s32.totalorder %s2512_s13, 7 }
   0x6   : > { %s3001_s14 = smov (%p29_p0, %s28_s14), 0  ;;  %s3003_s15 = smov (!%p29_p0, %s31_s15), %s2508_s12 }
   0x7   : > { %p312_p3 = pnand %p1792_p1, %p311_p2  ;;  %p33_p4 = scmp.ge.s32.totalorder %s3003_s15, 3 }
   0x8   : > { %p351_p5 = scmp.eq.s32.totalorder (!%p312_p3), %s2500_s10, 0  ;;  %p360_p6 = scmp.eq.s32.totalorder (!%p312_p3), %s2500_s10, 2 }
   0x9   : > { %s3005_s15 = smov (%p33_p4, %s3003_s15), 0  ;;  %315 = sbr.rel (%p312_p3) target bundleno = 1584 (0x630), region = 56 }
   0xa   : > { %p1797_p9 = scmp.ne.s32.totalorder (!%p312_p3), %s2500_s10, 0 }
  0x10   : > { %s352_s16 = scalar_select %p351_p5, %s2496_s30, 1 }
  0x11   : > { %s361_s17 = scalar_select %p360_p6, %s2496_s30, 0 }
  0x12   : > { %p353_p7 = scmp.lt.s32.totalorder %s352_s16, 1  ;;  %373 = sbr.rel (%p1797_p9) target bundleno = 556 (0x22c), region = 60 }
  0x13   : > { %p362_p8 = scmp.lt.s32.totalorder %s361_s17, 1  ;;  %p1798_p10 = scmp.ne.s32.totalorder (!%p1797_p9), %s2496_s30, 0 }
  0x14   : > { %s3007_s16 = smov (!%p353_p7, %s352_s16), 1 }
  0x15   : > { %s3009_s17 = smov (!%p362_p8, %s361_s17), 1  ;;  %s1898_s18 = sshll.u32 %s3007_s16, 4 }
  0x16   : > { %s357_s21 = scalar_lea.vmem %s2986_s0, %s1898_s18  ;;  %s1899_s22 = sshll.u32 %s3009_s17, 4 }
  0x17   : > { %s2618_s25 = scalar_lea.vmem %s2995_s9, %s1899_s22 }
  0x19   : > { %377 = sbr.rel (%p1798_p10) target bundleno = 32 (0x20), region = 64  ;;  %vm378_vm0 = vcmask (!%p1798_p10), 523264   ;;  %vm381_vm1 = vcmask (!%p1798_p10), 517120   ;;  %vm383_vm2 = vcmask (!%p1798_p10), 57344   ;;  %v2514_v0 = vmov (!%p1798_p10), 0.0  }
  0x1a   : > { %379 = vst.msk [vmem:[#allocation2] sm:$0xff] (!%p1798_p10), %vm378_vm0, %v2514_v0  ;;  %380 = vst.msk [vmem:[#allocation2 + $0x8] sm:$0xff] (!%p1798_p10), %vm378_vm0, %v2514_v0 }
  0x1b   : > { %382 = vst.msk [vmem:[#allocation2 + $0x10] sm:$0x3] (!%p1798_p10), %vm381_vm1, %v2514_v0 }
  0x1c   : > { %384 = vst.msk [vmem:[#allocation6] sm:$0x1] (!%p1798_p10), %vm383_vm2, %v2514_v0  ;;  %385 = vst.msk [vmem:[#allocation7] sm:$0x1] (!%p1798_p10), %vm383_vm2, %v2514_v0 }
  0x20 PF: > { %v2434_v1 = vld [vmem:[%s2987_s1 + $0x20] sm:$0xff]   ;;  %v2515_v2 = vmov 0.0   ;;  %v2435_v3 = vld [vmem:[%s2987_s1 + $0x28] sm:$0xff]   ;;  %vm2516_vm3 = vmmov 0   ;;  %vm388_vm4 = vcmask 523264   ;;  %v2517_v6 = vmov 0.0|0.0  }
  0x21   : > { %2018 = vmatprep.subr.bf16.mxu0 %v2515_v2  ;;  %2026 = vmatprep.mubr.msk.bf16.mxu0 %vm2516_vm3, %v2515_v2  ;;  %v386_v4 = vld [vmem:[%s357_s21] sm:$0xff]  ;;  %v387_v5 = vld [vmem:[%s357_s21 + $0x8] sm:$0xff]  ;;  %v2436_v7 = vld [vmem:[%s2987_s1 + $0x30] sm:$0xff]   ;;  %s1830_s16 = sshll.u32 %s2496_s30, 4  ;;  %vm740_vm5 = vcmask 57344  }
  0x22   : > { %2019 = vmatpush3.bf16.msra.mxu0 %v2434_v1  ;;  %2086 = vmatprep.mubr.msk.f32.mxu1 %vm2516_vm3, %v2515_v2  ;;  %389 = vst.msk [vmem:[#allocation2 + $0x1] sm:$0xff] %vm388_vm4, %v386_v4  ;;  %390 = vst.msk [vmem:[#allocation2 + $0x9] sm:$0xff] %vm388_vm4, %v387_v5  ;;  %v2437_v8 = vld [vmem:[%s2987_s1 + $0x38] sm:$0xff]   ;;  %v2438_v12 = vld [vmem:[%s2987_s1] sm:$0xff]   ;;  %s633_s17 = scalar_lea.vmem [#allocation4], %s1830_s16 }
  0x23   : > { %2020 = vmatprep.subr.bf16.mxu0 %v2515_v2  ;;  %2274 = vmatprep.subr.bf16.mxu1 %v2517_v6  ;;  %v652_v13 = vld [vmem:[%s2989_s3] sm:$0xff]  ;;  %v653_v14 = vld [vmem:[%s2989_s3 + $0x8] sm:$0xff]  ;;  %v654_v16 = vld [vmem:[%s2989_s3 + $0x10] sm:$0xff] }
  0x24   : > { %v2655_v15 = vpack.c.bf16 %v653_v14, %v652_v13  ;;  %v655_v17 = vld [vmem:[%s2989_s3 + $0x18] sm:$0xff]  ;;  %v2439_v18 = vld [vmem:[%s2987_s1 + $0x8] sm:$0xff]   ;;  %v656_v20 = vld [vmem:[%s2989_s3 + $0x20] sm:$0xff] }
  0x25   : > { %v2671_v19 = vpack.c.bf16 %v655_v17, %v654_v16  ;;  %v657_v21 = vld [vmem:[%s2989_s3 + $0x28] sm:$0xff]  ;;  %v2440_v22 = vld [vmem:[%s2987_s1 + $0x10] sm:$0xff]   ;;  %v659_v25 = vld [vmem:[%s2989_s3 + $0x38] sm:$0xff] }
  0x26   : > { %2021 = vmatpush3.bf16.msra.mxu0 %v2435_v3  ;;  %2276 = vmatpush3.bf16.msra.mxu1 %v2655_v15  ;;  %v2685_v23 = vpack.c.bf16 %v657_v21, %v656_v20  ;;  %v658_v24 = vld [vmem:[%s2989_s3 + $0x30] sm:$0xff]  ;;  %v2441_v26 = vld [vmem:[%s2987_s1 + $0x18] sm:$0xff]   ;;  %v2442_v31 = vld [vmem:[%s2987_s1 + $0x40] sm:$0xff]  }
  0x27   : > { %2022 = vmatprep.subr.bf16.mxu0 %v2515_v2  ;;  %2277 = vmatprep.subr.bf16.mxu1 %v2517_v6  ;;  %v2699_v29 = vpack.c.bf16 %v659_v25, %v658_v24  ;;  %v2443_v32 = vld [vmem:[%s2987_s1 + $0x48] sm:$0xff]   ;;  %v2444_v33 = vld [vmem:[%s2987_s1 + $0x50] sm:$0xff]   ;;  %v2445_v34 = vld [vmem:[%s2987_s1 + $0x58] sm:$0xff]  }
  0x28   : > { %v660_v38 = vld [vmem:[%s2989_s3 + $0x40] sm:$0xff]  ;;  %v661_v39 = vld [vmem:[%s2989_s3 + $0x48] sm:$0xff]  ;;  %v662_v41 = vld [vmem:[%s2989_s3 + $0x50] sm:$0xff] }
  0x29   : > { %v402_v9 = vld [vmem:[#allocation2 + $0x1] sm:$0xff]  ;;  %v403_v10 = vld [vmem:[#allocation2 + $0x9] sm:$0xff]  ;;  %v2287_v40 = vpack.c.bf16 %v661_v39, %v660_v38  ;;  %v663_v42 = vld [vmem:[%s2989_s3 + $0x58] sm:$0xff] }
  0x2a   : > { %2023 = vmatpush3.bf16.msra.mxu0 %v2436_v7  ;;  %v404_v11 = vpack.c.bf16 %v403_v10, %v402_v9  ;;  %2279 = vmatpush3.bf16.msra.mxu1 %v2671_v19  ;;  %v391_v27 = vld [vmem:[#allocation2] sm:$0xff]  ;;  %v392_v28 = vld [vmem:[#allocation2 + $0x8] sm:$0xff]  ;;  %v2290_v43 = vpack.c.bf16 %v663_v42, %v662_v41  ;;  %v666_v47 = vld [vmem:[%s2989_s3 + $0x70] sm:$0xff] }
  0x2b   : > { %2024 = vmatprep.subr.bf16.mxu0 %v2515_v2  ;;  %2280 = vmatprep.subr.bf16.mxu1 %v2517_v6  ;;  %v393_v30 = vpack.c.bf16 %v392_v28, %v391_v27  ;;  %v550_v35 = vld [vmem:[#allocation2 + $0x2] sm:$0xff]  ;;  %v551_v36 = vld [vmem:[#allocation2 + $0xa] sm:$0xff]  ;;  %v667_v48 = vld [vmem:[%s2989_s3 + $0x78] sm:$0xff] }
  0x2c   : > { %v552_v37 = vpack.c.bf16 %v551_v36, %v550_v35  ;;  %v664_v44 = vld [vmem:[%s2989_s3 + $0x60] sm:$0xff]  ;;  %v665_v45 = vld [vmem:[%s2989_s3 + $0x68] sm:$0xff]  ;;  %v2296_v49 = vpack.c.bf16 %v667_v48, %v666_v47  ;;  %v668_v7 = vld [vmem:[#allocation6] sm:$0x1] }
  0x2d   : > { %v2293_v46 = vpack.c.bf16 %v665_v45, %v664_v44 }
  0x2e   : > { %2025 = vmatpush3.bf16.msra.mxu0 %v2437_v8  ;;  %2282 = vmatpush3.bf16.msra.mxu1 %v2685_v23 }
  0x2f   : > { %2030 = vmatprep.subr.bf16.mxu0 %v2515_v2  ;;  %2283 = vmatprep.subr.bf16.mxu1 %v2517_v6 }
  0x31   : > { %2027 = vmatmul.mubr.msk.bf16.vlgmr.msra.gmra.mrb[0].mxu0 %vm388_vm4, %v404_v11  ;;  %v742_v11 = vld [vmem:[#allocation7] sm:$0x1] }
  0x32   : > { %2031 = vmatpush3.bf16.msra.mxu0 %v2438_v12  ;;  %2038 = vmatprep.mubr.msk.bf16.mxu0 %vm2516_vm3, %v2515_v2 }
  0x33   : > { %2032 = vmatprep.subr.bf16.mxu0 %v2515_v2  ;;  %2285 = vmatpush3.bf16.msra.mxu1 %v2699_v29 }
  0x34   : > { %2286 = vmatprep.subr.bf16.mxu1 %v2517_v6 }
  0x36   : > { %2033 = vmatpush3.bf16.msra.mxu0 %v2439_v18 }
  0x37   : > { %2034 = vmatprep.subr.bf16.mxu0 %v2515_v2  ;;  %2288 = vmatpush3.bf16.msra.mxu1 %v2287_v40 }
  0x38   : > { %2289 = vmatprep.subr.bf16.mxu1 %v2517_v6 }
  0x3a   : > { %2035 = vmatpush3.bf16.msra.mxu0 %v2440_v22 }
  0x3b   : > { %2036 = vmatprep.subr.bf16.mxu0 %v2515_v2  ;;  %2291 = vmatpush3.bf16.msra.mxu1 %v2290_v43 }
  0x3c   : > { %2292 = vmatprep.subr.bf16.mxu1 %v2517_v6 }
  0x3e   : > { %2037 = vmatpush3.bf16.msra.mxu0 %v2441_v26 }
  0x3f   : > { %2042 = vmatprep.subr.bf16.mxu0 %v2515_v2  ;;  %2294 = vmatpush3.bf16.msra.mxu1 %v2293_v46 }
  0x40   : > { %2295 = vmatprep.subr.bf16.mxu1 %v2517_v6 }
  0x41   : > { %2039 = vmatmul.mubr.msk.bf16.vlgmr.msra.gmra.mrb[0].mxu0 %vm388_vm4, %v393_v30 }
  0x42   : > { %2043 = vmatpush3.bf16.msra.mxu0 %v2442_v31  ;;  %2050 = vmatprep.mubr.msk.bf16.mxu0 %vm2516_vm3, %v2515_v2 }
  0x43   : > { %2044 = vmatprep.subr.bf16.mxu0 %v2515_v2  ;;  %2297 = vmatpush3.bf16.msra.mxu1 %v2296_v49 }
  0x44   : > { %2298 = vmatprep.subr.bf16.mxu1 %v2517_v6 }
  0x46   : > { %2045 = vmatpush3.bf16.msra.mxu0 %v2443_v32 }
  0x47   : > { %2046 = vmatprep.subr.bf16.mxu0 %v2515_v2 }
  0x4a   : > { %2047 = vmatpush3.bf16.msra.mxu0 %v2444_v33 }
  0x4b   : > { %2048 = vmatprep.subr.bf16.mxu0 %v2515_v2 }
  0x4e   : > { %2049 = vmatpush3.bf16.msra.mxu0 %v2445_v34 }
  0x51   : > { %2051 = vmatmul.mubr.msk.bf16.vlgmr.msra.gmra.mrb[0].mxu0 %vm388_vm4, %v552_v37 }
 0x124   : > { %v623_v50 = vpop.f32.mrb[0].mxu0 }
 0x125   : > { %634 = vst [vmem:[%s633_s17] sm:$0xff] %v623_v50  ;;  %v2052_v51 = vpop.f32.mrb[1].mxu0  ;;  %v643_v53 = vmul.f32 %v623_v50, %v623_v50 }
 0x126   : > { %v626_v52 = vpop.f32.mrb[2].mxu0 }
 0x127   : > { %635 = vst [vmem:[%s633_s17 + $0x8] sm:$0xff] %v626_v52  ;;  %v636_v54 = vadd.f32 %v626_v52, %v623_v50  ;;  %v644_v55 = vmul.f32 %v626_v52, %v626_v52  ;;  %v2053_v56 = vpop.f32.mrb[3].mxu0 }
 0x129   : > { %v637_v57 = vrot.slane %v636_v54, 4  ;;  %v645_v58 = vadd.f32 %v644_v55, %v643_v53 }
 0x12b   : > { %v638_v59 = vadd.f32 %v637_v57, %v636_v54  ;;  %v646_v0 = vrot.slane %v645_v58, 4 }
 0x12d   : > { %v639_v60 = vrot.slane %v638_v59, 2  ;;  %v647_v1 = vadd.f32 %v646_v0, %v645_v58 }
 0x12f   : > { %v640_v61 = vadd.f32 %v639_v60, %v638_v59  ;;  %v648_v3 = vrot.slane %v647_v1, 2 }
 0x131   : > { %v641_v62 = vrot.slane %v640_v61, 1 }
 0x133   : > { %v642_v63 = vadd.f32 %v641_v62, %v640_v61 }
 0x135   : > { %2087 = vmatmul.mubr.f32.vlgmr.msra.gmra.mrb[0].mxu1 %v642_v63 }
 0x136   : > { %2300 = vmatpush3.bf16.msra.mxu1 %v2655_v15  ;;  %2121 = vmatprep.mubr.msk.f32.mxu1 %vm2516_vm3, %v2515_v2  ;;  %v649_v2 = vadd.f32 %v648_v3, %v647_v1 }
 0x137   : > { %2301 = vmatprep.subr.bf16.mxu1 %v2517_v6 }
 0x138   : > { %v650_v4 = vrot.slane %v649_v2, 1 }
 0x13a   : > { %2303 = vmatpush3.bf16.msra.mxu1 %v2671_v19  ;;  %v651_v5 = vadd.f32 %v650_v4, %v649_v2 }
 0x13b   : > { %2304 = vmatprep.subr.bf16.mxu1 %v2517_v6 }
 0x13e   : > { %2306 = vmatpush3.bf16.msra.mxu1 %v2685_v23 }
 0x13f   : > { %2307 = vmatprep.subr.bf16.mxu1 %v2517_v6 }
 0x142   : > { %2309 = vmatpush3.bf16.msra.mxu1 %v2699_v29 }
 0x143   : > { %2310 = vmatprep.subr.bf16.mxu1 %v2517_v6 }
 0x146   : > { %2312 = vmatpush3.bf16.msra.mxu1 %v2287_v40 }
 0x147   : > { %2313 = vmatprep.subr.bf16.mxu1 %v2517_v6 }
 0x14a   : > { %2315 = vmatpush3.bf16.msra.mxu1 %v2290_v43 }
 0x14b   : > { %2316 = vmatprep.subr.bf16.mxu1 %v2517_v6 }
 0x14e   : > { %2318 = vmatpush3.bf16.msra.mxu1 %v2293_v46 }
 0x14f   : > { %2319 = vmatprep.subr.bf16.mxu1 %v2517_v6 }
 0x152   : > { %2321 = vmatpush3.bf16.msra.mxu1 %v2296_v49 }
 0x155   : > { %2122 = vmatmul.mubr.f32.vlgmr.msra.gmra.mrb[2].mxu1 %v651_v5 }
 0x208   : > { %v735_v8 = vpop.f32.mrb[0].mxu1 }
 0x209   : > { %v739_v9 = vadd.f32 %v735_v8, %v668_v7  ;;  %v2088_v10 = vpop.f32.mrb[1].mxu1 }
 0x20b   : > { %741 = vst.msk [vmem:[#allocation6] sm:$0x1] %vm740_vm5, %v739_v9 }
 0x228   : > { %v809_v12 = vpop.f32.mrb[2].mxu1 }
 0x229   : > { %v813_v13 = vadd.f32 %v809_v12, %v742_v11  ;;  %v2123_v14 = vpop.f32.mrb[3].mxu1 }
 0x22b   : > { %814 = vst.msk [vmem:[#allocation7] sm:$0x1] %vm740_vm5, %v813_v13 }
 0x22c PF: > { %p1831_p11 = scmp.ne.s32.totalorder %s2500_s10, 1 }
 0x22d   : > { %p1832_p12 = scmp.ne.s32.totalorder (!%p1831_p11), %s2496_s30, 0 }
 0x22e   : > { %818 = sbr.rel (%p1831_p11) target bundleno = 1335 (0x537), region = 68 }
 0x235   : > { %822 = sbr.rel (%p1832_p12) target bundleno = 572 (0x23c), region = 72  ;;  %vm826_vm6 = vcmask (!%p1832_p12), 57344   ;;  %v2518_v6 = vmov (!%p1832_p12), 0.0  }
 0x236   : > { %823 = vst [vmem:[#allocation3] sm:$0xff] (!%p1832_p12), %v2518_v6  ;;  %824 = vst [vmem:[#allocation3 + $0x8] sm:$0xff] (!%p1832_p12), %v2518_v6 }
 0x237   : > { %825 = vst [vmem:[#allocation3 + $0x10] sm:$0x3] (!%p1832_p12), %v2518_v6  ;;  %827 = vst.msk [vmem:[#allocation8] sm:$0x1] (!%p1832_p12), %vm826_vm6, %v2518_v6 }
 0x238   : > { %828 = vst.msk [vmem:[#allocation9] sm:$0x1] (!%p1832_p12), %vm826_vm6, %v2518_v6 }
 0x23c PF: > { %v843_v15 = vld [vmem:[%s2990_s4] sm:$0xff]  ;;  %v829_v16 = vld [vmem:[#allocation6] sm:$0x1]  ;;  %v2519_v17 = vmov 0.0   ;;  %vm2520_vm7 = vmmov 0   ;;  %v2449_v24 = vld [vmem:[%s2988_s2 + $0x48] sm:$0xff]   ;;  %v995_v46 = vlaneseq }
 0x23d   : > { %2124 = vmatprep.subr.mxu0 %v2519_v17  ;;  %2126 = vmatprep.mubr.msk.f32.mxu0 %vm2520_vm7, %v2519_v17  ;;  %v831_v18 = vmul.f32 0.001953125, %v829_v16  ;;  %v832_v19 = vld [vmem:[#allocation7] sm:$0x1]  ;;  %v2447_v21 = vld [vmem:[%s2988_s2 + $0x40] sm:$0xff]   ;;  %vm844_vm8 = vcmask 64512   ;;  %v2448_v34 = vld [vmem:[%s2988_s2 + $0x8] sm:$0xff]  }
 0x23e   : > { %2125 = vmatpush3.msra.mxu0 %v843_v15  ;;  %v833_v20 = vmul.f32 0.001953125, %v832_v19  ;;  %2134 = vmatprep.subr.bf16.mxu1 %v2519_v17  ;;  %v2451_v26 = vld [vmem:[%s2988_s2 + $0x50] sm:$0xff]   ;;  %v836_v27 = vld [vmem:[%s2991_s5] sm:$0x1]  ;;  %v2453_v36 = vld [vmem:[%s2988_s2 + $0x58] sm:$0xff]   ;;  %v996_v47 = vshrl.u32 %v995_v46, 7 }
 0x23f   : > { %2129 = vmatprep.subr.mxu0 %v2519_v17  ;;  %v834_v22 = vmul.f32 %v831_v18, %v831_v18  ;;  %2150 = vmatprep.mubr.msk.bf16.mxu1 %vm2520_vm7, %v2519_v17  ;;  %v840_v30 = vld [vmem:[%s2992_s6] sm:$0x1]  ;;  %v2450_v35 = vld [vmem:[%s2988_s2 + $0x10] sm:$0xff]   ;;  %v2452_v38 = vld [vmem:[%s2988_s2 + $0x18] sm:$0xff]   ;;  %s1835_s17 = sshll.u32 %s2496_s30, 4  ;;  %vm1446_vm9 = vcmask 57344  }
 0x240   : > { %2135 = vmatpush3.bf16.msra.mxu1 %v2447_v21  ;;  %v2446_v32 = vld [vmem:[%s2988_s2] sm:$0xff]   ;;  %v2457_v39 = vld [vmem:[%s2988_s2 + $0x68] sm:$0xff]   ;;  %v2459_v41 = vld [vmem:[%s2988_s2 + $0x70] sm:$0xff]   ;;  %v997_v48 = vsub.s32 0, %v996_v47  ;;  %s992_s18 = scalar_lea.vmem [#allocation4], %s1835_s17  ;;  %s1339_s19 = scalar_lea.vmem [#allocation5], %s1835_s17 }
 0x241   : > { %v835_v23 = vsub.f32 %v833_v20, %v834_v22  ;;  %2136 = vmatprep.subr.bf16.mxu1 %v2519_v17  ;;  %v2455_v37 = vld [vmem:[%s2988_s2 + $0x60] sm:$0xff]   ;;  %v2456_v42 = vld [vmem:[%s2988_s2 + $0x28] sm:$0xff]   ;;  %v2461_v43 = vld [vmem:[%s2988_s2 + $0x78] sm:$0xff]  }
 0x242   : > { %v2454_v40 = vld [vmem:[%s2988_s2 + $0x20] sm:$0xff]   ;;  %v2458_v44 = vld [vmem:[%s2988_s2 + $0x30] sm:$0xff]   ;;  %v2460_v45 = vld [vmem:[%s2988_s2 + $0x38] sm:$0xff]  }
 0x243   : > { %v837_v25 = vadd.f32 1e-05, %v835_v23  ;;  %v993_v52 = vld [vmem:[%s992_s18] sm:$0xff]  ;;  %v994_v53 = vld [vmem:[%s992_s18 + $0x8] sm:$0xff]  ;;  %v2464_v5 = vld [vmem:[%s2988_s2 + $0x90] sm:$0xff]  }
 0x244   : > { %2137 = vmatpush3.bf16.msra.mxu1 %v2449_v24  ;;  %v2462_v3 = vld [vmem:[%s2988_s2 + $0x80] sm:$0xff]   ;;  %v2463_v4 = vld [vmem:[%s2988_s2 + $0x88] sm:$0xff]   ;;  %v2465_v7 = vld [vmem:[%s2988_s2 + $0x98] sm:$0xff]  }
 0x245   : > { %2470 = vrsqrt.f32 %v837_v25  ;;  %2138 = vmatprep.subr.bf16.mxu1 %v2519_v17  ;;  %v2466_v8 = vld [vmem:[%s2988_s2 + $0xa0] sm:$0xff]   ;;  %v2467_v9 = vld [vmem:[%s2988_s2 + $0xa8] sm:$0xff]   ;;  %v2468_v10 = vld [vmem:[%s2988_s2 + $0xb0] sm:$0xff]  }
 0x246   : > { %v2469_v11 = vld [vmem:[%s2988_s2 + $0xb8] sm:$0xff]   ;;  %v1358_v6 = vld [vmem:[%s2989_s3] sm:$0xff]  ;;  %v1360_v16 = vld [vmem:[%s2989_s3 + $0x10] sm:$0xff] }
 0x247   : > { %v1361_v20 = vld [vmem:[%s2989_s3 + $0x18] sm:$0xff]  ;;  %v1362_v22 = vld [vmem:[%s2989_s3 + $0x20] sm:$0xff]  ;;  %v1363_v23 = vld [vmem:[%s2989_s3 + $0x28] sm:$0xff] }
 0x248   : > { %2139 = vmatpush3.bf16.msra.mxu1 %v2451_v26  ;;  %v2326_v21 = vpack.c.bf16 %v1361_v20, %v1360_v16  ;;  %v2329_v24 = vpack.c.bf16 %v1363_v23, %v1362_v22  ;;  %v1364_v25 = vld [vmem:[%s2989_s3 + $0x30] sm:$0xff]  ;;  %v1365_v26 = vld [vmem:[%s2989_s3 + $0x38] sm:$0xff] }
 0x249   : > { %2140 = vmatprep.subr.bf16.mxu1 %v2519_v17 }
 0x24c   : > { %2141 = vmatpush3.bf16.msra.mxu1 %v2453_v36 }
 0x24d   : > { %2142 = vmatprep.subr.bf16.mxu1 %v2519_v17 }
 0x24f   : > { %v2471_v28 = vpop.eup %2470 }
 0x250   : > { %v839_v29 = vmul.f32 %v2471_v28, %v836_v27  ;;  %2143 = vmatpush3.bf16.msra.mxu1 %v2455_v37  ;;  %v2332_v27 = vpack.c.bf16 %v1365_v26, %v1364_v25  ;;  %v1366_v28 = vld [vmem:[%s2989_s3 + $0x40] sm:$0xff]  ;;  %v1372_v37 = vld [vmem:[%s2989_s3 + $0x70] sm:$0xff] }
 0x251   : > { %2144 = vmatprep.subr.bf16.mxu1 %v2519_v17 }
 0x252   : > { %v841_v31 = vmul.f32 %v839_v29, %v831_v18  ;;  %2127 = vmatmul.mubr.msk.f32.vlgmr.msra.gmra.mrb[0].mxu0 %vm844_vm8, %v839_v29  ;;  %v2521_v18 = vmov 0.0|0.0   ;;  %v1367_v29 = vld [vmem:[%s2989_s3 + $0x48] sm:$0xff] }
 0x253   : > { %2130 = vmatpush3.msra.mxu0 %v843_v15  ;;  %2131 = vmatprep.mubr.msk.f32.mxu0 %vm2520_vm7, %v2519_v17  ;;  %v1359_v15 = vld [vmem:[%s2989_s3 + $0x8] sm:$0xff] }
 0x254   : > { %v842_v33 = vsub.f32 %v840_v30, %v841_v31  ;;  %2154 = vmatprep.subr.bf16.mxu0 %v2519_v17  ;;  %2145 = vmatpush3.bf16.msra.mxu1 %v2457_v39  ;;  %v2323_v19 = vpack.c.bf16 %v1359_v15, %v1358_v6  ;;  %v2335_v30 = vpack.c.bf16 %v1367_v29, %v1366_v28  ;;  %v1368_v31 = vld [vmem:[%s2989_s3 + $0x50] sm:$0xff] }
 0x255   : > { %2146 = vmatprep.subr.bf16.mxu1 %v2519_v17 }
 0x256   : > { %2132 = vmatmul.mubr.msk.f32.vlgmr.msra.gmra.mrb[2].mxu0 %vm844_vm8, %v842_v33 }
 0x257   : > { %2155 = vmatpush3.bf16.msra.mxu0 %v2446_v32  ;;  %2170 = vmatprep.mubr.msk.bf16.mxu0 %vm2520_vm7, %v2519_v17  ;;  %v1369_v32 = vld [vmem:[%s2989_s3 + $0x58] sm:$0xff] }
 0x258   : > { %2156 = vmatprep.subr.bf16.mxu0 %v2519_v17  ;;  %2147 = vmatpush3.bf16.msra.mxu1 %v2459_v41  ;;  %v2338_v33 = vpack.c.bf16 %v1369_v32, %v1368_v31 }
 0x259   : > { %2148 = vmatprep.subr.bf16.mxu1 %v2519_v17 }
 0x25b   : > { %2157 = vmatpush3.bf16.msra.mxu0 %v2448_v34  ;;  %v1370_v34 = vld [vmem:[%s2989_s3 + $0x60] sm:$0xff] }
 0x25c   : > { %2158 = vmatprep.subr.bf16.mxu0 %v2519_v17  ;;  %2149 = vmatpush3.bf16.msra.mxu1 %v2461_v43 }
 0x25d   : > { %2322 = vmatprep.subr.bf16.mxu1 %v2521_v18 }
 0x25f   : > { %2159 = vmatpush3.bf16.msra.mxu0 %v2450_v35  ;;  %v1371_v35 = vld [vmem:[%s2989_s3 + $0x68] sm:$0xff] }
 0x260   : > { %2160 = vmatprep.subr.bf16.mxu0 %v2519_v17  ;;  %v2341_v36 = vpack.c.bf16 %v1371_v35, %v1370_v34 }
 0x263   : > { %2161 = vmatpush3.bf16.msra.mxu0 %v2452_v38  ;;  %v1373_v38 = vld [vmem:[%s2989_s3 + $0x78] sm:$0xff] }
 0x264   : > { %2162 = vmatprep.subr.bf16.mxu0 %v2519_v17  ;;  %v2344_v39 = vpack.c.bf16 %v1373_v38, %v1372_v37 }
 0x267   : > { %2163 = vmatpush3.bf16.msra.mxu0 %v2454_v40 }
 0x268   : > { %2164 = vmatprep.subr.bf16.mxu0 %v2519_v17 }
 0x26b   : > { %2165 = vmatpush3.bf16.msra.mxu0 %v2456_v42 }
 0x26c   : > { %2166 = vmatprep.subr.bf16.mxu0 %v2519_v17 }
 0x26f   : > { %2167 = vmatpush3.bf16.msra.mxu0 %v2458_v44 }
 0x270   : > { %2168 = vmatprep.subr.bf16.mxu0 %v2519_v17 }
 0x273   : > { %2169 = vmatpush3.bf16.msra.mxu0 %v2460_v45 }
 0x274   : > { %2174 = vmatprep.subr.bf16.mxu0 %v2519_v17 }
 0x325   : > { %v914_v49 = vpop.f32.mrb[0].mxu0 }
 0x326   : > { %v998_v50 = vrot.slane %v914_v49, %v997_v48  ;;  %v2128_v51 = vpop.f32.mrb[1].mxu0 }
 0x328   : > { %v999_v55 = vmul.f32 %v998_v50, %v993_v52  ;;  %v1000_v56 = vmul.f32 %v998_v50, %v994_v53 }
 0x329   : > { %v987_v54 = vpop.f32.mrb[2].mxu0 }
 0x32a   : > { %v1004_v57 = vrot.slane %v987_v54, %v997_v48  ;;  %v2133_v58 = vpop.f32.mrb[3].mxu0 }
 0x32c   : > { %v1005_v59 = vadd.f32 %v1004_v57, %v999_v55  ;;  %v1006_v60 = vadd.f32 %v1004_v57, %v1000_v56 }
 0x32e   : > { %v1007_v61 = vmax.f32 %v1005_v59, 0.0  ;;  %v1008_v62 = vmax.f32 %v1006_v60, 0.0 }
 0x330   : > { %1009 = vst [vmem:[#allocation3 + $0x1] sm:$0xff] %v1007_v61  ;;  %1010 = vst [vmem:[#allocation3 + $0x9] sm:$0xff] %v1008_v62  ;;  %v1032_v63 = vpack.c.bf16 %v1008_v62, %v1007_v61 }
 0x332   : > { %2151 = vmatmul.mubr.bf16.vlgmr.msra.gmra.mrb[0].mxu1 %v1032_v63 }
 0x333   : > { %2226 = vmatprep.mubr.msk.f32.mxu1 %vm2520_vm7, %v2519_v17  ;;  %2324 = vmatpush3.bf16.msra.mxu1 %v2323_v19 }
 0x334   : > { %2325 = vmatprep.subr.bf16.mxu1 %v2521_v18 }
 0x337   : > { %v1011_v0 = vld [vmem:[#allocation3] sm:$0xff]  ;;  %v1012_v1 = vld [vmem:[#allocation3 + $0x8] sm:$0xff]  ;;  %2327 = vmatpush3.bf16.msra.mxu1 %v2326_v21 }
 0x338   : > { %v1013_v2 = vpack.c.bf16 %v1012_v1, %v1011_v0  ;;  %v1228_v12 = vld [vmem:[#allocation3 + $0x2] sm:$0xff]  ;;  %v1229_v13 = vld [vmem:[#allocation3 + $0xa] sm:$0xff]  ;;  %2328 = vmatprep.subr.bf16.mxu1 %v2521_v18  ;;  %v1374_v1 = vld [vmem:[#allocation8] sm:$0x1] }
 0x339   : > { %v1230_v14 = vpack.c.bf16 %v1229_v13, %v1228_v12 }
 0x33a   : > { %2171 = vmatmul.mubr.bf16.vlgmr.msra.gmra.mrb[4].mxu0 %v1013_v2 }
 0x33b   : > { %2175 = vmatpush3.bf16.msra.mxu0 %v2462_v3  ;;  %2190 = vmatprep.mubr.msk.bf16.mxu0 %vm2520_vm7, %v2519_v17 }
 0x33c   : > { %2176 = vmatprep.subr.bf16.mxu0 %v2519_v17  ;;  %2330 = vmatpush3.bf16.msra.mxu1 %v2329_v24 }
 0x33d   : > { %2331 = vmatprep.subr.bf16.mxu1 %v2521_v18 }
 0x33f   : > { %2177 = vmatpush3.bf16.msra.mxu0 %v2463_v4 }
 0x340   : > { %2178 = vmatprep.subr.bf16.mxu0 %v2519_v17  ;;  %2333 = vmatpush3.bf16.msra.mxu1 %v2332_v27 }
 0x341   : > { %2334 = vmatprep.subr.bf16.mxu1 %v2521_v18 }
 0x343   : > { %2179 = vmatpush3.bf16.msra.mxu0 %v2464_v5  ;;  %v1448_v5 = vld [vmem:[#allocation9] sm:$0x1] }
 0x344   : > { %2180 = vmatprep.subr.bf16.mxu0 %v2519_v17  ;;  %2336 = vmatpush3.bf16.msra.mxu1 %v2335_v30 }
 0x345   : > { %2337 = vmatprep.subr.bf16.mxu1 %v2521_v18 }
 0x347   : > { %2181 = vmatpush3.bf16.msra.mxu0 %v2465_v7 }
 0x348   : > { %2182 = vmatprep.subr.bf16.mxu0 %v2519_v17  ;;  %2339 = vmatpush3.bf16.msra.mxu1 %v2338_v33 }
 0x349   : > { %2340 = vmatprep.subr.bf16.mxu1 %v2521_v18 }
 0x34b   : > { %2183 = vmatpush3.bf16.msra.mxu0 %v2466_v8 }
 0x34c   : > { %2184 = vmatprep.subr.bf16.mxu0 %v2519_v17  ;;  %2342 = vmatpush3.bf16.msra.mxu1 %v2341_v36 }
 0x34d   : > { %2343 = vmatprep.subr.bf16.mxu1 %v2521_v18 }
 0x34f   : > { %2185 = vmatpush3.bf16.msra.mxu0 %v2467_v9 }
 0x350   : > { %2186 = vmatprep.subr.bf16.mxu0 %v2519_v17  ;;  %2345 = vmatpush3.bf16.msra.mxu1 %v2344_v39 }
 0x351   : > { %2346 = vmatprep.subr.bf16.mxu1 %v2521_v18 }
 0x353   : > { %2187 = vmatpush3.bf16.msra.mxu0 %v2468_v10 }
 0x354   : > { %2188 = vmatprep.subr.bf16.mxu0 %v2519_v17 }
 0x357   : > { %2189 = vmatpush3.bf16.msra.mxu0 %v2469_v11 }
 0x35a   : > { %2191 = vmatmul.mubr.bf16.vlgmr.msra.gmra.mrb[4].mxu0 %v1230_v14 }
 0x405   : > { %v1132_v40 = vpop.f32.mrb[0].mxu1 }
 0x406   : > { %v2152_v41 = vpop.f32.mrb[1].mxu1 }
 0x407   : > { %v1135_v42 = vpop.f32.mrb[2].mxu1 }
 0x408   : > { %v2153_v43 = vpop.f32.mrb[3].mxu1 }
 0x42d   : > { %v1330_v44 = vpop.f32.mrb[4].mxu0 }
 0x42e   : > { %v2378_v45 = vadd.f32 %v1330_v44, %v1132_v40  ;;  %v2192_v46 = vpop.f32.mrb[5].mxu0 }
 0x42f   : > { %v1333_v47 = vpop.f32.mrb[6].mxu0 }
 0x430   : > { %1340 = vst [vmem:[%s1339_s19] sm:$0xff] %v2378_v45  ;;  %v2379_v48 = vadd.f32 %v1333_v47, %v1135_v42  ;;  %v2193_v49 = vpop.f32.mrb[7].mxu0  ;;  %v1349_v50 = vmul.f32 %v2378_v45, %v2378_v45 }
 0x432   : > { %1341 = vst [vmem:[%s1339_s19 + $0x8] sm:$0xff] %v2379_v48  ;;  %v1342_v51 = vadd.f32 %v2379_v48, %v2378_v45  ;;  %v1350_v52 = vmul.f32 %v2379_v48, %v2379_v48 }
 0x434   : > { %v1343_v53 = vrot.slane %v1342_v51, 4  ;;  %v1351_v54 = vadd.f32 %v1350_v52, %v1349_v50 }
 0x436   : > { %v1344_v55 = vadd.f32 %v1343_v53, %v1342_v51  ;;  %v1352_v60 = vrot.slane %v1351_v54, 4 }
 0x438   : > { %v1345_v56 = vrot.slane %v1344_v55, 2  ;;  %v1353_v61 = vadd.f32 %v1352_v60, %v1351_v54 }
 0x43a   : > { %v1346_v57 = vadd.f32 %v1345_v56, %v1344_v55  ;;  %v1354_v62 = vrot.slane %v1353_v61, 2 }
 0x43c   : > { %v1347_v58 = vrot.slane %v1346_v57, 1 }
 0x43e   : > { %v1348_v59 = vadd.f32 %v1347_v58, %v1346_v57 }
 0x440   : > { %2227 = vmatmul.mubr.f32.vlgmr.msra.gmra.mrb[4].mxu1 %v1348_v59 }
 0x441   : > { %2348 = vmatpush3.bf16.msra.mxu1 %v2323_v19  ;;  %2261 = vmatprep.mubr.msk.f32.mxu1 %vm2520_vm7, %v2519_v17  ;;  %v1355_v17 = vadd.f32 %v1354_v62, %v1353_v61 }
 0x442   : > { %2349 = vmatprep.subr.bf16.mxu1 %v2521_v18 }
 0x443   : > { %v1356_v63 = vrot.slane %v1355_v17, 1 }
 0x445   : > { %2351 = vmatpush3.bf16.msra.mxu1 %v2326_v21  ;;  %v1357_v0 = vadd.f32 %v1356_v63, %v1355_v17 }
 0x446   : > { %2352 = vmatprep.subr.bf16.mxu1 %v2521_v18 }
 0x449   : > { %2354 = vmatpush3.bf16.msra.mxu1 %v2329_v24 }
 0x44a   : > { %2355 = vmatprep.subr.bf16.mxu1 %v2521_v18 }
 0x44d   : > { %2357 = vmatpush3.bf16.msra.mxu1 %v2332_v27 }
 0x44e   : > { %2358 = vmatprep.subr.bf16.mxu1 %v2521_v18 }
 0x451   : > { %2360 = vmatpush3.bf16.msra.mxu1 %v2335_v30 }
 0x452   : > { %2361 = vmatprep.subr.bf16.mxu1 %v2521_v18 }
 0x455   : > { %2363 = vmatpush3.bf16.msra.mxu1 %v2338_v33 }
 0x456   : > { %2364 = vmatprep.subr.bf16.mxu1 %v2521_v18 }
 0x459   : > { %2366 = vmatpush3.bf16.msra.mxu1 %v2341_v36 }
 0x45a   : > { %2367 = vmatprep.subr.bf16.mxu1 %v2521_v18 }
 0x45d   : > { %2369 = vmatpush3.bf16.msra.mxu1 %v2344_v39 }
 0x460   : > { %2262 = vmatmul.mubr.f32.vlgmr.msra.gmra.mrb[6].mxu1 %v1357_v0 }
 0x513   : > { %v1441_v3 = vpop.f32.mrb[4].mxu1 }
 0x514   : > { %v1445_v2 = vadd.f32 %v1441_v3, %v1374_v1  ;;  %v2228_v4 = vpop.f32.mrb[5].mxu1 }
 0x516   : > { %1447 = vst.msk [vmem:[#allocation8] sm:$0x1] %vm1446_vm9, %v1445_v2 }
 0x533   : > { %v1515_v7 = vpop.f32.mrb[6].mxu1 }
 0x534   : > { %v1519_v8 = vadd.f32 %v1515_v7, %v1448_v5  ;;  %v2263_v9 = vpop.f32.mrb[7].mxu1 }
 0x536   : > { %1520 = vst.msk [vmem:[#allocation9] sm:$0x1] %vm1446_vm9, %v1519_v8 }
 0x537 PF: > { %p1892_p13 = scmp.ne.s32.totalorder %s2500_s10, 2 }
 0x538   : > { %v1539_v10 = vld [vmem:[%s2990_s4] sm:$0xff] (!%p1892_p13)  ;;  %v1525_v11 = vld [vmem:[#allocation8] sm:$0x1] (!%p1892_p13)  ;;  %v2522_v12 = vmov (!%p1892_p13), 0.0   ;;  %vm2523_vm10 = vmmov (!%p1892_p13), 0   ;;  %vm1540_vm11 = vcmask (!%p1892_p13), 64512   ;;  %v1691_v25 = vlaneseq (!%p1892_p13) }
 0x539   : > { %1524 = sbr.rel (%p1892_p13) target bundleno = 1584 (0x630), region = 76  ;;  %2264 = vmatprep.subr.mxu0 (!%p1892_p13), %v2522_v12  ;;  %2266 = vmatprep.mubr.msk.f32.mxu0 (!%p1892_p13), %vm2523_vm10, %v2522_v12  ;;  %v1527_v13 = vmul.f32 (!%p1892_p13), 0.001953125, %v1525_v11  ;;  %v1532_v19 = vld [vmem:[%s2993_s7] sm:$0x1] (!%p1892_p13)  ;;  %s1895_s24 = sshll.u32 (!%p1892_p13), %s2496_s30, 4 }
 0x53a   : > { %2265 = vmatpush3.msra.mxu0 (!%p1892_p13), %v1539_v10  ;;  %2269 = vmatprep.subr.mxu1 (!%p1892_p13), %v2522_v12  ;;  %v1536_v22 = vld [vmem:[%s2994_s8] sm:$0x1] (!%p1892_p13)  ;;  %v1692_v26 = vshrl.u32 (!%p1892_p13), %v1691_v25, 7  ;;  %s1688_s26 = scalar_lea.vmem (!%p1892_p13), [#allocation5], %s1895_s24 }
 0x53b   : > { %v1530_v15 = vmul.f32 (!%p1892_p13), %v1527_v13, %v1527_v13  ;;  %2270 = vmatpush3.msra.mxu1 (!%p1892_p13), %v1539_v10  ;;  %2271 = vmatprep.mubr.msk.f32.mxu1 (!%p1892_p13), %vm2523_vm10, %v2522_v12  ;;  %v1689_v29 = vld [vmem:[%s1688_s26] sm:$0xff] (!%p1892_p13)  ;;  %v1690_v30 = vld [vmem:[%s1688_s26 + $0x8] sm:$0xff] (!%p1892_p13) }
 0x53c   : > { %v1693_v27 = vsub.s32 (!%p1892_p13), 0, %v1692_v26 }
 0x53d   : > { %v1528_v14 = vld [vmem:[#allocation9] sm:$0x1] (!%p1892_p13) }
 0x53e   : > { %v1529_v6 = vmul.f32 (!%p1892_p13), 0.001953125, %v1528_v14 }
 0x540   : > { %v1531_v16 = vsub.f32 %v1529_v6, %v1530_v15 }
 0x542   : > { %v1533_v18 = vadd.f32 1e-05, %v1531_v16 }
 0x544   : > { %2472 = vrsqrt.f32 %v1533_v18 }
 0x54e   : > { %v2473_v20 = vpop.eup %2472 }
 0x54f   : > { %v1535_v21 = vmul.f32 %v2473_v20, %v1532_v19 }
 0x551   : > { %2267 = vmatmul.mubr.msk.f32.vlgmr.msra.gmra.mrb[0].mxu0 %vm1540_vm11, %v1535_v21  ;;  %v1537_v23 = vmul.f32 %v1535_v21, %v1527_v13 }
 0x553   : > { %v1538_v24 = vsub.f32 %v1536_v22, %v1537_v23 }
 0x555   : > { %2272 = vmatmul.mubr.msk.f32.vlgmr.msra.gmra.mrb[0].mxu1 %vm1540_vm11, %v1538_v24 }
 0x624   : > { %v1610_v28 = vpop.f32.mrb[0].mxu0 }
 0x625   : > { %v1694_v31 = vrot.slane %v1610_v28, %v1693_v27  ;;  %v2268_v32 = vpop.f32.mrb[1].mxu0 }
 0x627   : > { %v1695_v33 = vmul.f32 %v1694_v31, %v1689_v29  ;;  %v1696_v34 = vmul.f32 %v1694_v31, %v1690_v30 }
 0x628   : > { %v1683_v35 = vpop.f32.mrb[0].mxu1 }
 0x629   : > { %v1700_v36 = vrot.slane %v1683_v35, %v1693_v27  ;;  %v2273_v37 = vpop.f32.mrb[1].mxu1 }
 0x62b   : > { %v1701_v38 = vadd.f32 %v1700_v36, %v1695_v33  ;;  %v1702_v39 = vadd.f32 %v1700_v36, %v1696_v34 }
 0x62d   : > { %v1703_v40 = vmax.f32 %v1701_v38, 0.0  ;;  %v1704_v41 = vmax.f32 %v1702_v39, 0.0 }
 0x62f   : > { %1705 = vst [vmem:[%s2618_s25] sm:$0xff] %v1703_v40  ;;  %1706 = vst [vmem:[%s2618_s25 + $0x8] sm:$0xff] %v1704_v41 }
 0x630 PF: > { %s19_s13 = sadd.s32 1, %s2512_s13   ;;  %s2996_s30 = smov %s2504_s11 }
 0x631   : > { %p16_p0 = scmp.ge.s32.totalorder %s19_s13, 8   ;;  %s2997_s10 = smov %s2508_s12 }
 0x632   : > { %s2998_s11 = smov %s3001_s14  ;;  %s2999_s12 = smov %s3005_s15 }
 0x633   :  { %18 = sbr.rel (!%p16_p0) target bundleno = 3 (0x3), region = 114 }

</bundles_post_ra>
